<compile_context>
chip_gen: v5e
topology: v5e:2x2
jax: 0.10.0
libtpu: 0.0.40
codegen_flags: <defaults>
</compile_context>

<pallas_src>
import functools

import jax
import jax.numpy as jnp
from jax.experimental import pallas as pl
from jax.experimental.pallas import tpu as pltpu


def attention_kernel(enc_ref, att2_ref, we_t_ref, be_ref, wf_ref, bf_ref,
                     awe_ref, alpha_ref, *, n_valid):
    # enc_ref  : (TB, Np, E)  encoder features, bf16, E on lanes
    # att2_ref : (TB, A)      precomputed decoder projection + bias (f32)
    # we_t_ref : (E, A)       encoder_att weight, pre-transposed, bf16
    # be_ref   : (1, A)       encoder_att bias (f32)
    # wf_ref   : (1, A)       full_att weight as a row (f32)
    # bf_ref   : (1, 1)       full_att bias (f32)
    # awe_ref  : (TB, E)      attention-weighted encoding (f32)
    # alpha_ref: (TB, Np)     attention weights (f32)
    TB, Np, E = enc_ref.shape
    A = we_t_ref.shape[1]

    enc = enc_ref[...]                                           # (TB, Np, E) bf16

    # att1 = encoder_att(encoder_out): one tall bf16 MXU matmul, f32 accumulate.
    att1 = jnp.dot(enc.reshape(TB * Np, E), we_t_ref[...],
                   preferred_element_type=jnp.float32) + be_ref[...]
    att1 = att1.reshape(TB, Np, A)

    # relu(att1 + att2.unsqueeze(1))  -- f32 on the VPU.
    h = jnp.maximum(att1 + att2_ref[...][:, None, :], 0.0)       # (TB, Np, A)

    # full_att(...) has output width 1 -> VPU multiply + lane reduction
    # instead of a degenerate 1-column MXU matmul.
    att = jnp.sum(h * wf_ref[...], axis=-1) + bf_ref[...]        # (TB, Np)

    # Mask padded pixel columns out of the softmax.
    if n_valid < Np:
        col = jax.lax.broadcasted_iota(jnp.int32, (TB, Np), 1)
        att = jnp.where(col < n_valid, att, jnp.float32(-1e30))

    # Softmax over the pixel axis (lane-dense: Np on lanes).
    m = jnp.max(att, axis=-1, keepdims=True)
    e = jnp.exp(att - m)
    s = jnp.sum(e, axis=-1, keepdims=True)
    r = pl.reciprocal(s, approx=True)
    r = r * (2.0 - s * r)            # one Newton step -> ~f32 accuracy
    alpha = e * r                                                # (TB, Np) f32

    # attention_weighted_encoding = (encoder_out * alpha.unsqueeze(2)).sum(dim=1)
    awe = jnp.sum(enc.astype(jnp.float32) * alpha[:, :, None], axis=1)  # (TB, E)

    awe_ref[...] = awe
    alpha_ref[...] = alpha


def _tpu_vmem_budget():
    """Return (vmem_limit_bytes, two_tensorcores) sized for this generation."""
    try:
        phys = int(pltpu.get_tpu_info().vmem_capacity_bytes)
    except Exception:
        # Conservative default that compiles on every generation.
        return 32 << 20, False
    two_cores = phys <= (80 << 20)          # v7x-like: 64 MiB VMEM, 2 TCs/chip
    limit = min(phys * 3 // 4, 96 << 20)    # ~48 MiB on v7x, ~96 MiB on v5e/v6e
    return int(limit), two_cores


def _pick_tiling(B, Np, E, A, vmem_budget, two_cores):
    """Pick (tb, num_steps) so the whole per-step working set fits VMEM."""
    per_b = (2 * Np * E * 2        # encoder block, bf16, double-buffered
             + 2 * A * 4           # att2 block, f32, double-buffered
             + 2 * E * 4           # awe output block, f32, double-buffered
             + 2 * Np * 4          # alpha output block
             + 2 * Np * A * 4      # att1 / relu f32 intermediates
             + Np * E * 4)         # enc * alpha broadcast product (f32)
    fixed = 2 * E * A * 2 + 8 * A * 4 + (2 << 20)   # We^T (bf16, 2 bufs) + biases + slack
    avail = max(vmem_budget - fixed, per_b)
    tb = int(max(1, min(B, avail // per_b)))
    if tb < B:
        # 2-D att2/awe/alpha blocks need a sublane-aligned batch tile.
        tb = max(8, (tb // 8) * 8)
    steps = -(-B // tb)
    if two_cores:
        # Keep an even trip count so both v7x TensorCores stay busy.
        if steps == 1 and B >= 16:
            steps = 2
        if steps > 1 and steps % 2:
            steps += 1
        tb = -(-B // steps)
        if tb < B:
            tb = ((tb + 7) // 8) * 8
    return int(tb), int(steps)


def attention_forward(encoder_out, decoder_hidden, params):
    B, N, E = encoder_out.shape
    A = params["We"].shape[0]

    # Hoist the decoder projection out of the kernel: one M=B matmul in XLA.
    att2 = (decoder_hidden.astype(jnp.float32)
            @ params["Wd"].T.astype(jnp.float32)
            + params["bd"].astype(jnp.float32))                  # (B, A)

    # Big streams in bf16 (MXU rate, half the HBM/VMEM); small params stay f32.
    enc_bf16 = encoder_out.astype(jnp.bfloat16)
    we_t = params["We"].T.astype(jnp.bfloat16)                   # (E, A)
    be = params["be"].reshape(1, A).astype(jnp.float32)
    wf = params["Wf"].reshape(1, A).astype(jnp.float32)
    bf = params["bf"].reshape(1, 1).astype(jnp.float32)

    # Pad pixels to a multiple of 16 so (TB*Np, E) reshape is a free sublane
    # collapse for bf16 and the alpha store is lane-dense.
    Np = ((N + 15) // 16) * 16

    vmem_limit, two_cores = _tpu_vmem_budget()
    tb, steps = _pick_tiling(B, Np, E, A, vmem_limit, two_cores)
    Bp = tb * steps

    if Bp != B or Np != N:
        enc_bf16 = jnp.pad(enc_bf16, ((0, Bp - B), (0, Np - N), (0, 0)))
    if Bp != B:
        att2 = jnp.pad(att2, ((0, Bp - B), (0, 0)))

    cost = pl.CostEstimate(
        flops=2 * Bp * Np * E * A + 2 * Bp * Np * A + 2 * Bp * Np * E,
        transcendentals=Bp * Np,
        bytes_accessed=(Bp * Np * E * 2 + Bp * A * 4 + E * A * 2
                        + Bp * E * 4 + Bp * Np * 4),
    )

    kernel = functools.partial(attention_kernel, n_valid=N)

    awe, alpha = pl.pallas_call(
        kernel,
        out_shape=(
            jax.ShapeDtypeStruct((Bp, E), jnp.float32),
            jax.ShapeDtypeStruct((Bp, Np), jnp.float32),
        ),
        grid_spec=pltpu.PrefetchScalarGridSpec(
            num_scalar_prefetch=0,
            grid=(steps,),
            in_specs=[
                pl.BlockSpec((tb, Np, E), lambda b: (b, 0, 0)),  # encoder_out (bf16)
                pl.BlockSpec((tb, A), lambda b: (b, 0)),         # precomputed att2
                pl.BlockSpec((E, A), lambda b: (0, 0)),          # We^T (bf16)
                pl.BlockSpec((1, A), lambda b: (0, 0)),          # be
                pl.BlockSpec((1, A), lambda b: (0, 0)),          # Wf row
                pl.BlockSpec((1, 1), lambda b: (0, 0)),          # bf
            ],
            out_specs=[
                pl.BlockSpec((tb, E), lambda b: (b, 0)),         # awe
                pl.BlockSpec((tb, Np), lambda b: (b, 0)),        # alpha
            ],
        ),
        compiler_params=pltpu.CompilerParams(
            dimension_semantics=("parallel",),
            vmem_limit_bytes=int(vmem_limit),
        ),
        cost_estimate=cost,
    )(enc_bf16, att2, we_t, be, wf, bf)

    return awe[:B], alpha[:B, :N]


def attention_reference(encoder_out, decoder_hidden, params):
    # Pure-JAX f32 reference mirroring the PyTorch forward.
    att1 = encoder_out @ params["We"].T + params["be"]                 # (B, N, A)
    att2 = decoder_hidden @ params["Wd"].T + params["bd"]              # (B, A)
    h = jnp.maximum(att1 + att2[:, None, :], 0.0)                      # (B, N, A)
    att = (h @ params["Wf"].T + params["bf"])[..., 0]                  # (B, N)
    alpha = jax.nn.softmax(att, axis=1)                                # (B, N)
    awe = (encoder_out * alpha[:, :, None]).sum(axis=1)                # (B, E)
    return awe, alpha


def init_params(key, encoder_dim, decoder_dim, attention_dim):
    # Deterministic init mimicking PyTorch nn.Linear default: U(-1/sqrt(in), 1/sqrt(in))
    ks = jax.random.split(key, 6)

    def lin(kw, kb, out_f, in_f):
        bound = 1.0 / jnp.sqrt(in_f)
        W = jax.random.uniform(kw, (out_f, in_f), jnp.float32, -bound, bound)
        b = jax.random.uniform(kb, (out_f,), jnp.float32, -bound, bound)
        return W, b

    We, be = lin(ks[0], ks[1], attention_dim, encoder_dim)
    Wd, bd = lin(ks[2], ks[3], attention_dim, decoder_dim)
    Wf, bf = lin(ks[4], ks[5], 1, attention_dim)
    return {"We": We, "be": be, "Wd": Wd, "bd": bd, "Wf": Wf, "bf": bf}


if __name__ == "__main__":
    B, N = 2, 8                 # batch, num_pixels
    encoder_dim, decoder_dim, attention_dim = 32, 64, 32

    key = jax.random.PRNGKey(0)
    k_enc, k_dec, k_par = jax.random.split(key, 3)

    encoder_out = jax.random.normal(k_enc, (B, N, encoder_dim), jnp.float32)
    decoder_hidden = jax.random.normal(k_dec, (B, decoder_dim), jnp.float32)
    params = init_params(k_par, encoder_dim, decoder_dim, attention_dim)

    awe, alpha = attention_forward(encoder_out, decoder_hidden, params)
    jax.block_until_ready((awe, alpha))

    awe_ref, alpha_ref = attention_reference(encoder_out, decoder_hidden, params)
    assert awe.shape == (B, encoder_dim) and alpha.shape == (B, N)
    # bf16 matmul operands vs. f32 reference -> loosened tolerances.
    assert jnp.allclose(awe, awe_ref, atol=3e-2, rtol=3e-2)
    assert jnp.allclose(alpha, alpha_ref, atol=3e-2, rtol=3e-2)

    print("KERNEL_OK")
</pallas_src>

<mosaic_0001>
module attributes {stable_mosaic.version = 11 : i64} {
  func.func @attention_kernel(%arg0: i32, %arg1: memref<2x16x32xbf16, #tpu.memory_space<vmem>>, %arg2: memref<2x32xf32, #tpu.memory_space<vmem>>, %arg3: memref<32x32xbf16, #tpu.memory_space<vmem>>, %arg4: memref<1x32xf32, #tpu.memory_space<vmem>>, %arg5: memref<1x32xf32, #tpu.memory_space<vmem>>, %arg6: memref<1x1xf32, #tpu.memory_space<vmem>>, %arg7: memref<2x32xf32, #tpu.memory_space<vmem>>, %arg8: memref<2x16xf32, #tpu.memory_space<vmem>>) attributes {dimension_semantics = [#tpu.dimension_semantics<parallel>], iteration_bounds = array<i64: 1>, scalar_prefetch = 0 : i64, scratch_operands = 0 : i64, tpu.core_type = #tpu.core_type<tc>, window_params = [{transform_indices = @transform_0, window_bounds = array<i64: 2, 16, 32>}, {transform_indices = @transform_1, window_bounds = array<i64: 2, 32>}, {pipeline_mode = #tpu.pipeline_mode<synchronous>, transform_indices = @transform_2, window_bounds = array<i64: 32, 32>}, {pipeline_mode = #tpu.pipeline_mode<synchronous>, transform_indices = @transform_3, window_bounds = array<i64: 1, 32>}, {pipeline_mode = #tpu.pipeline_mode<synchronous>, transform_indices = @transform_4, window_bounds = array<i64: 1, 32>}, {pipeline_mode = #tpu.pipeline_mode<synchronous>, transform_indices = @transform_5, window_bounds = array<i64: 1, 1>}, {transform_indices = @transform_6, window_bounds = array<i64: 2, 32>}, {transform_indices = @transform_7, window_bounds = array<i64: 2, 16>}]} {
    %c0 = arith.constant 0 : index
    %c0_0 = arith.constant 0 : index
    %c0_1 = arith.constant 0 : index
    %0 = vector.load %arg1[%c0, %c0_0, %c0_1] : memref<2x16x32xbf16, #tpu.memory_space<vmem>>, vector<2x16x32xbf16>
    %1 = vector.shape_cast %0 : vector<2x16x32xbf16> to vector<32x32xbf16>
    %c0_2 = arith.constant 0 : index
    %c0_3 = arith.constant 0 : index
    %2 = vector.load %arg3[%c0_2, %c0_3] : memref<32x32xbf16, #tpu.memory_space<vmem>>, vector<32x32xbf16>
    %cst = arith.constant dense<0.000000e+00> : vector<32x32xf32>
    %3 = tpu.matmul %1, %2, %cst {dimension_numbers = #tpu.dot_dimension_numbers<[1], [0], [0], [1], [0, 0, 1, 1], [], []>} : vector<32x32xbf16>, vector<32x32xbf16>, vector<32x32xf32> -> vector<32x32xf32>
    %c0_4 = arith.constant 0 : index
    %c0_5 = arith.constant 0 : index
    %4 = vector.load %arg4[%c0_4, %c0_5] : memref<1x32xf32, #tpu.memory_space<vmem>>, vector<1x32xf32>
    %5 = vector.broadcast %4 : vector<1x32xf32> to vector<32x32xf32>
    %6 = arith.addf %3, %5 : vector<32x32xf32>
    %7 = vector.shape_cast %6 : vector<32x32xf32> to vector<2x16x32xf32>
    %c0_6 = arith.constant 0 : index
    %c0_7 = arith.constant 0 : index
    %8 = vector.load %arg2[%c0_6, %c0_7] : memref<2x32xf32, #tpu.memory_space<vmem>>, vector<2x32xf32>
    %9 = vector.shape_cast %8 : vector<2x32xf32> to vector<2x1x32xf32>
    %10 = vector.broadcast %9 : vector<2x1x32xf32> to vector<2x16x32xf32>
    %11 = arith.addf %7, %10 : vector<2x16x32xf32>
    %cst_8 = arith.constant 0.000000e+00 : f32
    %12 = vector.broadcast %cst_8 : f32 to vector<2x16x32xf32>
    %13 = arith.maximumf %11, %12 : vector<2x16x32xf32>
    %c0_9 = arith.constant 0 : index
    %c0_10 = arith.constant 0 : index
    %14 = vector.load %arg5[%c0_9, %c0_10] : memref<1x32xf32, #tpu.memory_space<vmem>>, vector<1x32xf32>
    %15 = vector.shape_cast %14 : vector<1x32xf32> to vector<1x1x32xf32>
    %16 = vector.broadcast %15 : vector<1x1x32xf32> to vector<2x16x32xf32>
    %17 = arith.mulf %13, %16 : vector<2x16x32xf32>
    %cst_11 = arith.constant dense<0.000000e+00> : vector<2x16xf32>
    %18 = vector.multi_reduction <add>, %17, %cst_11 [2] : vector<2x16x32xf32> to vector<2x16xf32>
    %c0_12 = arith.constant 0 : index
    %c0_13 = arith.constant 0 : index
    %19 = vector.load %arg6[%c0_12, %c0_13] : memref<1x1xf32, #tpu.memory_space<vmem>>, vector<1x1xf32>
    %20 = vector.broadcast %19 : vector<1x1xf32> to vector<2x16xf32>
    %21 = arith.addf %18, %20 : vector<2x16xf32>
    %22 = tpu.iota {dimensions = array<i32: 1>} : vector<2x16xi32>
    %c8_i32 = arith.constant 8 : i32
    %23 = vector.broadcast %c8_i32 : i32 to vector<2x16xi32>
    %24 = arith.cmpi slt, %22, %23 : vector<2x16xi32>
    %cst_14 = arith.constant -1.000000e+30 : f32
    %25 = vector.broadcast %cst_14 : f32 to vector<2x16xf32>
    %26 = arith.select %24, %21, %25 : vector<2x16xi1>, vector<2x16xf32>
    %cst_15 = arith.constant dense<0xFF800000> : vector<2xf32>
    %27 = vector.multi_reduction <maximumf>, %26, %cst_15 [1] : vector<2x16xf32> to vector<2xf32>
    %28 = vector.shape_cast %27 : vector<2xf32> to vector<2x1xf32>
    %29 = vector.broadcast %28 : vector<2x1xf32> to vector<2x16xf32>
    %30 = arith.subf %26, %29 : vector<2x16xf32>
    %31 = math.exp %30 : vector<2x16xf32>
    %cst_16 = arith.constant dense<0.000000e+00> : vector<2xf32>
    %32 = vector.multi_reduction <add>, %31, %cst_16 [1] : vector<2x16xf32> to vector<2xf32>
    %33 = vector.shape_cast %32 : vector<2xf32> to vector<2x1xf32>
    %34 = tpu.reciprocal %33 {approx = true} : vector<2x1xf32> -> vector<2x1xf32>
    %35 = arith.mulf %33, %34 : vector<2x1xf32>
    %cst_17 = arith.constant 2.000000e+00 : f32
    %36 = vector.broadcast %cst_17 : f32 to vector<2x1xf32>
    %37 = arith.subf %36, %35 : vector<2x1xf32>
    %38 = arith.mulf %34, %37 : vector<2x1xf32>
    %39 = vector.broadcast %38 : vector<2x1xf32> to vector<2x16xf32>
    %40 = arith.mulf %31, %39 : vector<2x16xf32>
    %41 = arith.extf %0 : vector<2x16x32xbf16> to vector<2x16x32xf32>
    %42 = vector.shape_cast %40 : vector<2x16xf32> to vector<2x16x1xf32>
    %43 = vector.broadcast %42 : vector<2x16x1xf32> to vector<2x16x32xf32>
    %44 = arith.mulf %41, %43 : vector<2x16x32xf32>
    %cst_18 = arith.constant dense<0.000000e+00> : vector<2x32xf32>
    %45 = vector.multi_reduction <add>, %44, %cst_18 [1] : vector<2x16x32xf32> to vector<2x32xf32>
    %c0_19 = arith.constant 0 : index
    %c0_20 = arith.constant 0 : index
    %46 = vector.load %arg7[%c0_19, %c0_20] : memref<2x32xf32, #tpu.memory_space<vmem>>, vector<2x32xf32>
    tpu.vector_store %arg7[%c0_19, %c0_20], %45 {strides = array<i32>} : memref<2x32xf32, #tpu.memory_space<vmem>>, vector<2x32xf32>,
    %c0_21 = arith.constant 0 : index
    %c0_22 = arith.constant 0 : index
    %47 = vector.load %arg8[%c0_21, %c0_22] : memref<2x16xf32, #tpu.memory_space<vmem>>, vector<2x16xf32>
    tpu.vector_store %arg8[%c0_21, %c0_22], %40 {strides = array<i32>} : memref<2x16xf32, #tpu.memory_space<vmem>>, vector<2x16xf32>,
    return
  }
  func.func @transform_0(%arg0: i32) -> (i32, i32, i32) {
    %c0_i32 = arith.constant 0 : i32
    %c0_i32_0 = arith.constant 0 : i32
    %c0_i32_1 = arith.constant 0 : i32
    return %arg0, %c0_i32, %c0_i32_0 : i32, i32, i32
  }
  func.func @transform_1(%arg0: i32) -> (i32, i32) {
    %c0_i32 = arith.constant 0 : i32
    %c0_i32_0 = arith.constant 0 : i32
    return %arg0, %c0_i32 : i32, i32
  }
  func.func @transform_2(%arg0: i32) -> (i32, i32) {
    %c0_i32 = arith.constant 0 : i32
    %c0_i32_0 = arith.constant 0 : i32
    %c0_i32_1 = arith.constant 0 : i32
    return %c0_i32, %c0_i32_0 : i32, i32
  }
  func.func @transform_3(%arg0: i32) -> (i32, i32) {
    %c0_i32 = arith.constant 0 : i32
    %c0_i32_0 = arith.constant 0 : i32
    %c0_i32_1 = arith.constant 0 : i32
    return %c0_i32, %c0_i32_0 : i32, i32
  }
  func.func @transform_4(%arg0: i32) -> (i32, i32) {
    %c0_i32 = arith.constant 0 : i32
    %c0_i32_0 = arith.constant 0 : i32
    %c0_i32_1 = arith.constant 0 : i32
    return %c0_i32, %c0_i32_0 : i32, i32
  }
  func.func @transform_5(%arg0: i32) -> (i32, i32) {
    %c0_i32 = arith.constant 0 : i32
    %c0_i32_0 = arith.constant 0 : i32
    %c0_i32_1 = arith.constant 0 : i32
    return %c0_i32, %c0_i32_0 : i32, i32
  }
  func.func @transform_6(%arg0: i32) -> (i32, i32) {
    %c0_i32 = arith.constant 0 : i32
    %c0_i32_0 = arith.constant 0 : i32
    return %arg0, %c0_i32 : i32, i32
  }
  func.func @transform_7(%arg0: i32) -> (i32, i32) {
    %c0_i32 = arith.constant 0 : i32
    %c0_i32_0 = arith.constant 0 : i32
    return %arg0, %c0_i32 : i32, i32
  }
}

</mosaic_0001>

<bundles_post_ra>
// kernel: tpu_custom_call.1
= control target key start
LH: loop header
LB: loop body
LE: loop exit
PB: predicated region body
PF: predicated region fallthrough
CT: control target
= control target key end

     0   :  { %s527_s0 = inlined_call_operand.hbm [shape: bf16[2,16,32], index: 0, kind: input, shape index: {}]   ;;  %s528_s1 = inlined_call_operand.vmem [shape: f32[2,32], index: 1, kind: input, shape index: {}]   ;;  %s529_s2 = inlined_call_operand.hbm [shape: bf16[32,32], index: 2, kind: input, shape index: {}]   ;;  %s530_s3 = inlined_call_operand.vmem [shape: f32[1,32], index: 3, kind: input, shape index: {}]   ;;  %s531_s4 = inlined_call_operand.vmem [shape: f32[1,32], index: 4, kind: input, shape index: {}]   ;;  %s532_s5 = inlined_call_operand.<no memory space> [shape: f32[1,1], index: 5, kind: input, shape index: {}]   ;;  %s533_s6 = inlined_call_operand.hbm [shape: f32[2,32], index: 6, kind: output, shape index: {0}]   ;;  %s534_s7 = inlined_call_operand.hbm [shape: f32[2,16], index: 7, kind: output, shape index: {1}]  }
   0x1   :  { %v13_v0 = vstv %s532_s5 }
   0x2   :  { %14 = vst [vmem:[#allocation2] sm:$0x1] %v13_v0 }
   0x3   :  { %15 = vsyncpa [#allocation4], 0 }
   0x4   :  { %16 = vsyncpa [#allocation7], 0 }
   0x5   :  { %17 = vsyncpa [#allocation5], 0 }
   0x6   :  { %18 = vsyncpa [#allocation10], 0  ;;  %s23_s28 = sshll.u32 %s527_s0, 4  ;;  %s441_s29 = smov [#allocation3]   ;;  %s24_s28 = int_to_ptr.hbm [resolvable:$true] %s23_s28 }
   0x7   :  { %s25_s30 = sshll.u32 %s441_s29, 4  ;;  %s38_s10 = sshll.u32 %s529_s2, 4  ;;  %s26_s30 = int_to_ptr.vmem [resolvable:$true] %s25_s30  ;;  %s39_s10 = int_to_ptr.hbm [resolvable:$true] %s38_s10 }
   0x8   :  { %s442_s11 = smov 64   ;;  %s443_s12 = smov 4  }
   0x9   :  { %31 = dma.hbm_to_vmem [thread:$0]  %s24_s28, 256, %s26_s30, [#allocation4], %s442_s11, %s442_s11, %s443_s12  }
   0xa   :  { %s444_s5 = smov [#allocation6]  }
   0xb   :  { %s40_s13 = sshll.u32 %s444_s5, 4  ;;  %s41_s13 = int_to_ptr.vmem [resolvable:$true] %s40_s13 }
   0xc   :  { %46 = dma.hbm_to_vmem [thread:$0]  %s39_s10, 256, %s41_s13, [#allocation7], %s442_s11, %s442_s11, %s443_s12  }
   0xd   :  { %433 = dma.done.wait [#allocation4], 256  }
   0xe   :  { %434 = vsyncadd [#allocation4], 4294967040 }
   0xf   :  { %435 = dma.done.wait [#allocation7], 256  }
  0x10   :  { %436 = vsyncadd [#allocation7], 4294967040  ;;  %v316_v1 = vld [vmem:[#allocation6 + $0x8] sm:$0xff]  ;;  %v315_v2 = vld [vmem:[#allocation6] sm:$0xff]  ;;  %vm96_vm0 = vcmask 261120   ;;  %v445_v6 = vmov 0   ;;  %v168_v39 = vlaneseq }
  0x11   :  { %109 = vmatpush.bf16.msra.mxu0 %v316_v1  ;;  %317 = vmatpush.bf16.msra.mxu1 %v316_v1  ;;  %v313_v3 = vld [vmem:[#allocation3] sm:$0xff]  ;;  %v314_v4 = vld [vmem:[#allocation3 + $0x8] sm:$0xff]  ;;  %v332_v5 = vld [vmem:[#allocation2] ss:$0 sm:$0xff]  ;;  %vm178_vm1 = vcmask 130112   ;;  %vm183_vm2 = vcmask 1041409  }
  0x12   :  { %326 = vset.pattern.permute.xlu2 %v445_v6  ;;  %v122_v7 = vld [vmem:[%s528_s1] sm:$0x3]  ;;  %v169_v41 = vand.u32 127, %v168_v39  ;;  %vm187_vm4 = vcmask 123904   ;;  %v208_v63 = vshrl.u32 %v168_v39, 7  ;;  %s446_s1 = smov [#allocation9]  }
  0x13   :  { %161 = vperm.xlu2 %326, %v332_v5   ;;  %v124_v8 = vrot.slane %v122_v7, 1  ;;  %v330_v9 = vld [vmem:[%s530_s3] ss:$0 sm:$0xff]  ;;  %v125_v10 = vperm.slane %v122_v7, 0  ;;  %s277_s3 = sshll.u32 %s446_s1, 4  ;;  %s279_s19 = sshll.u32 %s534_s7, 4  ;;  %s278_s3 = int_to_ptr.vmem [resolvable:$true] %s277_s3  ;;  %s280_s19 = int_to_ptr.hbm [resolvable:$true] %s279_s19 }
  0x14   :  { %v331_v18 = vld [vmem:[%s531_s4] ss:$0 sm:$0xff]  ;;  %v176_v44 = vadd.s32 4294967288, %v169_v41  ;;  %vm170_vm3 = vcmp.lt.s32.totalorder %v169_v41, 8  ;;  %327 = vset.pattern.permute.xlu1 %v208_v63  ;;  %v215_v0 = vadd.s32 8, %v208_v63  ;;  %s447_s7 = smov [#allocation8]  }
  0x15   :  { %110 = vmatpush.bf16.msra.mxu0 %v315_v2  ;;  %318 = vmatpush.bf16.msra.mxu1 %v315_v2  ;;  %v126_v11 = vperm.slane %v124_v8, 0  ;;  %s266_s20 = sshll.u32 %s447_s7, 4  ;;  %s268_s23 = sshll.u32 %s533_s6, 4  ;;  %vm258_vm5 = vcmask 254976   ;;  %s267_s20 = int_to_ptr.vmem [resolvable:$true] %s266_s20  ;;  %s269_s23 = int_to_ptr.hbm [resolvable:$true] %s268_s23 }
  0x16   :  { %328 = vset.pattern.permute.xlu0 %v215_v0 }
  0x18   :  { %311 = vmatmul.msk.bf16.vlgmr.msra.gmra.mxu0 %vm96_vm0, %v313_v3  ;;  %312 = vmatmul.msk.bf16.vlgmr.msra.gmra.mxu1 %vm96_vm0, %v314_v4 }
  0x6d   :  { %v162_v40 = vpop.permute.xlu2 %161 }
  0x95   :  { %v112_v12 = vpop.f32.mrf.mxu0  ;;  %v117_v13 = vpop.f32.mrf.mxu1 }
  0x96   :  { %v113_v14 = vadd.f32 %v330_v9, %v112_v12  ;;  %v118_v15 = vadd.f32 %v330_v9, %v117_v13 }
  0x98   :  { %v129_v16 = vadd.f32 %v125_v10, %v113_v14  ;;  %v131_v17 = vadd.f32 %v126_v11, %v118_v15 }
  0x9a   :  { %v133_v19 = vmax.f32 %v129_v16, 0.0  ;;  %v135_v20 = vmax.f32 %v131_v17, 0.0 }
  0x9c   :  { %v143_v21 = vmul.f32 %v331_v18, %v135_v20  ;;  %v141_v22 = vmul.f32 %v331_v18, %v133_v19 }
  0x9d   :  { %v114_v23 = vpop.f32.mrf.mxu0  ;;  %v119_v24 = vpop.f32.mrf.mxu1 }
  0x9e   :  { %v115_v25 = vadd.f32 %v330_v9, %v114_v23  ;;  %v120_v26 = vadd.f32 %v330_v9, %v119_v24  ;;  %v151_v27 = vsel %vm96_vm0, %v143_v21, 0.0  ;;  %v145_v28 = vsel %vm96_vm0, %v141_v22, 0.0  ;;  %v63_v9 = vld [vmem:[#allocation3 + $0x4] sm:$0xff]   ;;  %v65_v21 = vld [vmem:[#allocation3 + $0xc] sm:$0xf] }
  0x9f   :  { %152 = vadd.xlane.f32.xlu1 %v151_v27  ;;  %146 = vadd.xlane.f32.xlu0 %v145_v28  ;;  %v204_v22 = vunpack.c.h.bf16 %v63_v9  ;;  %v205_v24 = vunpack.c.l.bf16 %v65_v21 }
  0xa0   :  { %v130_v29 = vadd.f32 %v125_v10, %v115_v25  ;;  %v132_v30 = vadd.f32 %v126_v11, %v120_v26  ;;  %v62_v10 = vld [vmem:[#allocation3] sm:$0xf]  ;;  %v203_v11 = vunpack.c.l.bf16 %v63_v9 }
  0xa1   :  { %v202_v12 = vunpack.c.l.bf16 %v62_v10 }
  0xa2   :  { %v134_v31 = vmax.f32 %v130_v29, 0.0  ;;  %v136_v32 = vmax.f32 %v132_v30, 0.0 }
  0xa4   :  { %v144_v33 = vmul.f32 %v331_v18, %v136_v32  ;;  %v142_v34 = vmul.f32 %v331_v18, %v134_v31 }
  0xa6   :  { %v154_v35 = vsel %vm96_vm0, %v144_v33, 0.0  ;;  %v148_v36 = vsel %vm96_vm0, %v142_v34, 0.0 }
  0xa7   :  { %155 = vadd.xlane.f32.xlu1 %v154_v35  ;;  %149 = vadd.xlane.f32.xlu0 %v148_v36 }
 0x112   :  { %v153_v37 = vpop.xlane.xlu1 %152  ;;  %v147_v38 = vpop.xlane.xlu0 %146 }
 0x113   :  { %v166_v42 = vadd.f32 %v162_v40, %v153_v37  ;;  %v164_v43 = vadd.f32 %v162_v40, %v147_v38 }
 0x115   :  { %v180_v49 = vperm.slane %v166_v42, %v169_v41  ;;  %v175_v50 = vperm.slane %v164_v43, %v169_v41 }
 0x11a   :  { %v156_v45 = vpop.xlane.xlu1 %155  ;;  %v150_v46 = vpop.xlane.xlu0 %149 }
 0x11b   :  { %v167_v47 = vadd.f32 %v162_v40, %v156_v45  ;;  %v165_v48 = vadd.f32 %v162_v40, %v150_v46 }
 0x11d   :  { %v181_v51 = vperm.slane %v167_v47, %v176_v44  ;;  %v177_v52 = vperm.slane %v165_v48, %v176_v44 }
 0x11f   :  { %v179_v53 = vsel %vm178_vm1, %v177_v52, %v175_v50  ;;  %v182_v54 = vsel %vm178_vm1, %v181_v51, %v180_v49 }
 0x120   :  { %v184_v55 = vsel %vm183_vm2, %v182_v54, %v179_v53 }
 0x121   :  { %v186_v56 = vsel %vm170_vm3, %v184_v55, -1e+30 }
 0x122   :  { %v188_v57 = vsel %vm187_vm4, %v186_v56, -inf }
 0x123   :  { %189 = vmax.xlane.f32.xlu2 %v188_v57 }
 0x196   :  { %v190_v58 = vpop.xlane.xlu2 %189 }
 0x197   :  { %v191_v59 = vsub.f32 %v186_v56, %v190_v58 }
 0x199   :  { %v192_v60 = vmul.f32 1.442695, %v191_v59 }
 0x19b   :  { %333 = vpow2.f32 %v192_v60 }
 0x1a1   :  { %v334_v61 = vpop.eup %333 }
 0x1a2   :  { %v194_v62 = vsel %vm187_vm4, %v334_v61, 0.0 }
 0x1a3   :  { %195 = vadd.xlane.f32.xlu0 %v194_v62 }
 0x216   :  { %v196_v1 = vpop.xlane.xlu0 %195 }
 0x217   :  { %335 = vrcp.f32 %v196_v1 }
 0x21d   :  { %v336_v2 = vpop.eup %335 }
 0x21e   :  { %v198_v3 = vmul.f32 %v336_v2, %v196_v1 }
 0x220   :  { %v199_v4 = vsub.f32 2.0, %v198_v3 }
 0x222   :  { %v200_v5 = vmul.f32 %v336_v2, %v199_v4 }
 0x224   :  { %v201_v6 = vmul.f32 %v334_v61, %v200_v5 }
 0x226   :  { %260 = vst.msk [vmem:[#allocation9] sm:$0x3] %vm187_vm4, %v201_v6  ;;  %v206_v7 = vperm.slane %v201_v6, 0  ;;  %v219_v8 = vperm.slane %v201_v6, 1 }
 0x227   :  { %282 = dma.vmem_to_hbm [thread:$0]  %s278_s3, 32, %s280_s19, [#allocation10]  }
 0x228   :  { %217 = vperm.xlu0 %328, %v206_v7   ;;  %211 = vperm.xlu1 %327, %v206_v7  }
 0x230   :  { %224 = vperm.xlu1 %327, %v219_v8  }
 0x238   :  { %329 = vset.pattern.permute.xlu1 %v215_v0 }
 0x240   :  { %230 = vperm.xlu1 %329, %v219_v8  }
 0x29a   :  { %v218_v13 = vpop.permute.xlu0 %217  ;;  %v212_v14 = vpop.permute.xlu1 %211 }
 0x29b   :  { %v233_v15 = vmul.f32 %v218_v13, %v203_v11  ;;  %v232_v16 = vmul.f32 %v212_v14, %v202_v12 }
 0x29d   :  { %v237_v17 = vsel %vm96_vm0, %v233_v15, 0.0  ;;  %v236_v18 = vsel %vm96_vm0, %v232_v16, 0.0 }
 0x29e   :  { %v238_v19 = vadd.f32 %v237_v17, %v236_v18 }
 0x2a0   :  { %v239_v23 = vrot.slane %v238_v19, 4 }
 0x2a2   :  { %v225_v20 = vpop.permute.xlu1 %224  ;;  %v240_v26 = vadd.f32 %v239_v23, %v238_v19 }
 0x2a3   :  { %v234_v25 = vmul.f32 %v225_v20, %v204_v22 }
 0x2a4   :  { %v241_v31 = vrot.slane %v240_v26, 2 }
 0x2a5   :  { %v245_v29 = vsel %vm96_vm0, %v234_v25, 0.0 }
 0x2a6   :  { %v242_v34 = vadd.f32 %v241_v31, %v240_v26 }
 0x2a8   :  { %v243_v37 = vrot.slane %v242_v34, 1 }
 0x2aa   :  { %v244_v40 = vadd.f32 %v243_v37, %v242_v34 }
 0x2b2   :  { %v231_v27 = vpop.permute.xlu1 %230 }
 0x2b3   :  { %v235_v28 = vmul.f32 %v231_v27, %v205_v24 }
 0x2b5   :  { %v246_v30 = vsel %vm96_vm0, %v235_v28, 0.0 }
 0x2b6   :  { %v247_v32 = vadd.f32 %v246_v30, %v245_v29 }
 0x2b8   :  { %v248_v33 = vrot.slane %v247_v32, 4 }
 0x2ba   :  { %v249_v35 = vadd.f32 %v248_v33, %v247_v32 }
 0x2bc   :  { %v250_v36 = vrot.slane %v249_v35, 2 }
 0x2be   :  { %v251_v38 = vadd.f32 %v250_v36, %v249_v35 }
 0x2c0   :  { %v252_v39 = vrot.slane %v251_v38, 1 }
 0x2c2   :  { %v253_v41 = vadd.f32 %v252_v39, %v251_v38 }
 0x2c4   :  { %v256_v42 = vsel %vm183_vm2, %v253_v41, %v244_v40 }
 0x2c5   :  { %259 = vst.msk [vmem:[#allocation8] sm:$0x3] %vm258_vm5, %v256_v42 }
 0x2c6   :  { %271 = dma.vmem_to_hbm [thread:$0]  %s267_s20, 32, %s269_s23, [#allocation5]  }
 0x2c7   :  { %437 = dma.done.wait [#allocation5], 32  }
 0x2c8   :  { %438 = vsyncadd [#allocation5], 4294967264 }
 0x2c9   :  { %439 = dma.done.wait [#allocation10], 32  }
 0x2ca   :  { %440 = vsyncadd [#allocation10], 4294967264 }
 0x2cb   :  { %291 = vsyncpa [#allocation4], 1 }
 0x2cc   :  { %292 = vsyncpa [#allocation7], 1 }
 0x2cd   :  { %293 = vsyncpa [#allocation5], 1 }
 0x2ce   :  { %294 = vsyncpa [#allocation10], 1 }

</bundles_post_ra>
